<compile_context>
chip_gen: v6e
topology: v6e:2x2x1
jax: 0.10.0
libtpu: 0.0.40
codegen_flags: <defaults>
</compile_context>

<pallas_src>
import functools

import numpy as np

import jax
import jax.numpy as jnp
from jax.experimental import pallas as pl
from jax.experimental.pallas import tpu as pltpu


# ----------------------------------------------------------------------------
# Fused whole-network Pallas kernel (one grid step == one batch tile)
# ----------------------------------------------------------------------------
def _ae_fused_kernel(*refs, num_layers, latent_index, relu_flags):
    """Full encoder+decoder for one batch tile, entirely in VMEM.

    refs layout (positional, as passed by pallas_call):
      refs[0]                 : x_ref      (C_in0*L0, N_tile)   f32
      refs[1 + 2*i + 0]       : m_ref[i]   (C_out_i*L_out_i, C_in_i*L_in_i)  bf16
      refs[1 + 2*i + 1]       : b_ref[i]   (C_out_i*L_out_i, 1)              f32
      refs[1 + 2*num_layers]  : z_ref      (C_lat*L_lat, N_tile)
      refs[2 + 2*num_layers]  : recon_ref  (C_in0*L_rec, N_tile)

    Every layer (Conv1d or ConvTranspose1d, both pre-lowered to one dense
    matrix) is a single lane-dense MXU matmul + f32 bias-add (+ ReLU).
    """
    x_ref = refs[0]
    layer_refs = refs[1:1 + 2 * num_layers]
    z_ref = refs[1 + 2 * num_layers]
    recon_ref = refs[2 + 2 * num_layers]

    h = x_ref[...].astype(jnp.float32)                       # (C0*L0, Nt)
    for i in range(num_layers):                               # static unroll
        m_ref = layer_refs[2 * i]                             # (CoLo, CiLi)
        b_ref = layer_refs[2 * i + 1]                         # (CoLo, 1)
        acc = jnp.dot(m_ref[...], h.astype(m_ref.dtype),      # MXU, lane = batch
                      preferred_element_type=jnp.float32)
        acc = acc + b_ref[...]                                # f32 VPU epilogue
        if relu_flags[i]:
            acc = jnp.maximum(acc, 0.0)
        h = acc

        if i == latent_index:                                 # encoder output z
            z_ref[...] = h.astype(z_ref.dtype)

    recon_ref[...] = h.astype(recon_ref.dtype)


# ----------------------------------------------------------------------------
# Host-side pre-lowering of Conv1d / ConvTranspose1d to one dense matrix
# ----------------------------------------------------------------------------
def _conv_dense_matrix(w, l_in, stride):
    """Conv1d (padding=0) -> M with M[(o,t),(i,l)] = w[o,i,k] iff l == t*s+k."""
    c_out, c_in, k = w.shape
    l_out = (l_in - k) // stride + 1
    sel = np.zeros((k, l_in, l_out), np.float32)              # 0/1 gather taps
    for kk in range(k):
        for t in range(l_out):
            sel[kk, t * stride + kk, t] = 1.0
    m = jnp.einsum('oik,klt->otil', w, jnp.asarray(sel),
                   precision=jax.lax.Precision.HIGHEST)
    return m.reshape(c_out * l_out, c_in * l_in), l_out


def _deconv_dense_matrix(w_t, l_in, stride, output_padding):
    """ConvTranspose1d (padding=0) -> M with M[(o,j),(i,t)] = w_t[i,o,k], j==t*s+k.

    Columns j >= (l_in-1)*stride + k (the output_padding tail) get no
    contribution and thus carry only the bias, matching PyTorch semantics.
    """
    c_in, c_out, k = w_t.shape
    l_out = (l_in - 1) * stride + k + output_padding
    u = np.zeros((k, l_in, l_out), np.float32)                # 0/1 scatter taps
    for kk in range(k):
        for t in range(l_in):
            u[kk, t, t * stride + kk] = 1.0
    m = jnp.einsum('iok,ktj->ojit', w_t, jnp.asarray(u),
                   precision=jax.lax.Precision.HIGHEST)
    return m.reshape(c_out * l_out, c_in * l_in), l_out


# ----------------------------------------------------------------------------
# AE_1dcnn forward (single fused pallas_call)
# ----------------------------------------------------------------------------
def ae_1dcnn_forward(params, x, *, layer_num, kernel_size_list, stride_list,
                     output_padding_list, n_tile=None, mxu_dtype=jnp.bfloat16):
    n, c_in0, l0 = x.shape
    num_layers = 2 * layer_num
    latent_index = layer_num - 1

    layer_m, layer_b, relu_flags, out_dims = [], [], [], []
    l_cur = l0
    # encoder: Conv1d layers
    for i in range(layer_num):
        w, b = params["enc"][i]                               # (C_out, C_in, K)
        m, l_out = _conv_dense_matrix(w, l_cur, stride_list[i])
        layer_m.append(m.astype(mxu_dtype))
        layer_b.append(jnp.repeat(b, l_out).reshape(-1, 1).astype(jnp.float32))
        relu_flags.append(i < layer_num - 1)
        out_dims.append((w.shape[0], l_out))
        l_cur = l_out
    # decoder: ConvTranspose1d layers
    for i in range(layer_num):
        w_t, b = params["dec"][i]                             # (C_in, C_out, K)
        j = layer_num - 1 - i
        m, l_out = _deconv_dense_matrix(w_t, l_cur, stride_list[j],
                                        output_padding_list[j])
        layer_m.append(m.astype(mxu_dtype))
        layer_b.append(jnp.repeat(b, l_out).reshape(-1, 1).astype(jnp.float32))
        relu_flags.append(i < layer_num - 1)
        out_dims.append((w_t.shape[1], l_out))
        l_cur = l_out

    c_lat, l_lat = out_dims[latent_index]
    c_rec, l_rec = out_dims[-1]

    # Layout change in the wrapper (not in-kernel): (N, C, L) -> (C*L, N)
    # so batch sits on lanes inside the kernel.
    x_flat = x.reshape(n, c_in0 * l0).T                       # (C*L, N)

    # Batch tile: lane-dense (multiple of 128) when the batch allows; a single
    # whole-batch block for tiny batches (no wasted serial grid steps on
    # v5e/v6e).  With N >= 2*N_tile the grid has >= 2 parallel steps so both
    # v7x TensorCores get work.
    if n_tile is None:
        n_tile = 256 if n >= 256 else (128 if n >= 128 else n)
    n_pad = pl.cdiv(n, n_tile) * n_tile
    if n_pad != n:
        x_flat = jnp.pad(x_flat, ((0, 0), (0, n_pad - n)))

    batch_map = lambda bi: (0, bi)                            # per-tile slab
    const_map = lambda bi: (0, 0)                             # VMEM-resident

    flat_inputs = [x_flat]
    in_specs = [pl.BlockSpec((c_in0 * l0, n_tile), batch_map)]
    for m_i, b_i in zip(layer_m, layer_b):
        flat_inputs += [m_i, b_i]
        in_specs += [pl.BlockSpec(m_i.shape, const_map),
                     pl.BlockSpec(b_i.shape, const_map)]

    out_shape = (jax.ShapeDtypeStruct((c_lat * l_lat, n_pad), x.dtype),
                 jax.ShapeDtypeStruct((c_rec * l_rec, n_pad), x.dtype))
    out_specs = [pl.BlockSpec((c_lat * l_lat, n_tile), batch_map),
                 pl.BlockSpec((c_rec * l_rec, n_tile), batch_map)]

    kernel = functools.partial(
        _ae_fused_kernel,
        num_layers=num_layers,
        latent_index=latent_index,
        relu_flags=tuple(bool(f) for f in relu_flags),
    )

    z_flat, recon_flat = pl.pallas_call(
        kernel,
        out_shape=out_shape,
        grid_spec=pltpu.PrefetchScalarGridSpec(
            num_scalar_prefetch=0,
            grid=(n_pad // n_tile,),                          # one step per batch tile
            in_specs=in_specs,
            out_specs=out_specs,
        ),
        compiler_params=pltpu.CompilerParams(
            dimension_semantics=("parallel",),                # megacore on v7x
        ),
    )(*flat_inputs)

    # Back to the PyTorch NCL layout in the wrapper (cheap XLA transpose).
    z = z_flat[:, :n].T.reshape(n, c_lat, l_lat)
    recon = recon_flat[:, :n].T.reshape(n, c_rec, l_rec)
    return z, recon


# ----------------------------------------------------------------------------
# Parameter init (deterministic) and a pure-JAX reference for validation
# ----------------------------------------------------------------------------
def make_params(key, layer_num, in_channel, channel_list, kernel_size_list):
    enc_ch = [in_channel] + list(channel_list)
    dec_ch = list(channel_list[::-1]) + [in_channel]
    params = {"enc": [], "dec": []}
    keys = jax.random.split(key, 2 * layer_num)
    for i in range(layer_num):
        k_w = kernel_size_list[i]
        w = 0.1 * jax.random.normal(keys[i], (enc_ch[i + 1], enc_ch[i], k_w), jnp.float32)
        bias = 0.1 * jax.random.normal(jax.random.fold_in(keys[i], 1), (enc_ch[i + 1],), jnp.float32)
        params["enc"].append((w, bias))
    for i in range(layer_num):
        k_w = kernel_size_list[layer_num - 1 - i]
        w = 0.1 * jax.random.normal(keys[layer_num + i], (dec_ch[i], dec_ch[i + 1], k_w), jnp.float32)
        bias = 0.1 * jax.random.normal(jax.random.fold_in(keys[layer_num + i], 1), (dec_ch[i + 1],), jnp.float32)
        params["dec"].append((w, bias))
    return params


def _conv1d_ref(x, w, b, stride):
    out = jax.lax.conv_general_dilated(
        x, w, window_strides=(stride,), padding="VALID",
        dimension_numbers=("NCH", "OIH", "NCH"),
        precision=jax.lax.Precision.HIGHEST)
    return out + b[None, :, None]


def _conv_transpose1d_ref(x, w_t, b, stride, output_padding):
    n, c_in, l_in = x.shape
    _, c_out, k = w_t.shape
    l_up = (l_in - 1) * stride + 1
    x_up = jnp.zeros((n, c_in, l_up), x.dtype).at[:, :, ::stride].set(x)
    x_pad = jnp.pad(x_up, ((0, 0), (0, 0), (k - 1, k - 1 + output_padding)))
    w_conv = jnp.flip(jnp.transpose(w_t, (1, 0, 2)), axis=2)
    return _conv1d_ref(x_pad, w_conv, b, 1)


def _ae_reference(params, x, *, layer_num, kernel_size_list, stride_list,
                  output_padding_list):
    z = x
    for i in range(layer_num):
        w, b = params["enc"][i]
        z = _conv1d_ref(z, w, b, stride_list[i])
        if i < layer_num - 1:
            z = jnp.maximum(z, 0.0)
    recon = z
    for i in range(layer_num):
        w, b = params["dec"][i]
        j = layer_num - 1 - i
        recon = _conv_transpose1d_ref(recon, w, b, stride_list[j],
                                      output_padding_list[j])
        if i < layer_num - 1:
            recon = jnp.maximum(recon, 0.0)
    return z, recon


if __name__ == "__main__":
    layer_num = 2
    in_channel = 4
    channel_list = [8, 16]
    kernel_size_list = [3, 3]
    stride_list = [2, 2]
    output_padding_list = [1, 0]   # so recon length == input length (16)
    # dropout_r = 0.0 -> Dropout is identity (inference semantics)

    key = jax.random.PRNGKey(0)
    k_x, k_p = jax.random.split(key)
    x = jax.random.normal(k_x, (2, in_channel, 16), jnp.float32)   # (N, C, L)
    params = make_params(k_p, layer_num, in_channel, channel_list, kernel_size_list)

    fwd = jax.jit(functools.partial(
        ae_1dcnn_forward,
        layer_num=layer_num,
        kernel_size_list=kernel_size_list,
        stride_list=stride_list,
        output_padding_list=output_padding_list))

    z, recon = fwd(params, x)
    jax.block_until_ready((z, recon))

    assert z.shape == (2, channel_list[-1], 3), z.shape
    assert recon.shape == x.shape, recon.shape

    # Validate against a pure-JAX reference of the PyTorch module
    # (bf16 MXU operands, f32 accumulation -> well within 1e-2).
    z_ref, recon_ref = _ae_reference(
        params, x, layer_num=layer_num, kernel_size_list=kernel_size_list,
        stride_list=stride_list, output_padding_list=output_padding_list)
    assert jnp.allclose(z, z_ref, atol=1e-2, rtol=1e-2), \
        float(jnp.max(jnp.abs(z - z_ref)))
    assert jnp.allclose(recon, recon_ref, atol=1e-2, rtol=1e-2), \
        float(jnp.max(jnp.abs(recon - recon_ref)))

    print("KERNEL_OK")
</pallas_src>

<mosaic_0001>
module attributes {stable_mosaic.version = 11 : i64} {
  func.func @_ae_fused_kernel(%arg0: i32, %arg1: memref<64x2xf32, #tpu.memory_space<vmem>>, %arg2: memref<56x64xbf16, #tpu.memory_space<vmem>>, %arg3: memref<56x1xf32, #tpu.memory_space<vmem>>, %arg4: memref<48x56xbf16, #tpu.memory_space<vmem>>, %arg5: memref<48x1xf32, #tpu.memory_space<vmem>>, %arg6: memref<56x48xbf16, #tpu.memory_space<vmem>>, %arg7: memref<56x1xf32, #tpu.memory_space<vmem>>, %arg8: memref<64x56xbf16, #tpu.memory_space<vmem>>, %arg9: memref<64x1xf32, #tpu.memory_space<vmem>>, %arg10: memref<48x2xf32, #tpu.memory_space<vmem>>, %arg11: memref<64x2xf32, #tpu.memory_space<vmem>>) attributes {dimension_semantics = [#tpu.dimension_semantics<parallel>], iteration_bounds = array<i64: 1>, scalar_prefetch = 0 : i64, scratch_operands = 0 : i64, tpu.core_type = #tpu.core_type<tc>, window_params = [{transform_indices = @transform_0, window_bounds = array<i64: 64, 2>}, {pipeline_mode = #tpu.pipeline_mode<synchronous>, transform_indices = @transform_1, window_bounds = array<i64: 56, 64>}, {pipeline_mode = #tpu.pipeline_mode<synchronous>, transform_indices = @transform_2, window_bounds = array<i64: 56, 1>}, {pipeline_mode = #tpu.pipeline_mode<synchronous>, transform_indices = @transform_3, window_bounds = array<i64: 48, 56>}, {pipeline_mode = #tpu.pipeline_mode<synchronous>, transform_indices = @transform_4, window_bounds = array<i64: 48, 1>}, {pipeline_mode = #tpu.pipeline_mode<synchronous>, transform_indices = @transform_5, window_bounds = array<i64: 56, 48>}, {pipeline_mode = #tpu.pipeline_mode<synchronous>, transform_indices = @transform_6, window_bounds = array<i64: 56, 1>}, {pipeline_mode = #tpu.pipeline_mode<synchronous>, transform_indices = @transform_7, window_bounds = array<i64: 64, 56>}, {pipeline_mode = #tpu.pipeline_mode<synchronous>, transform_indices = @transform_8, window_bounds = array<i64: 64, 1>}, {transform_indices = @transform_9, window_bounds = array<i64: 48, 2>}, {transform_indices = @transform_10, window_bounds = array<i64: 64, 2>}]} {
    %c0 = arith.constant 0 : index
    %c0_0 = arith.constant 0 : index
    %0 = vector.load %arg1[%c0, %c0_0] : memref<64x2xf32, #tpu.memory_space<vmem>>, vector<64x2xf32>
    %c0_1 = arith.constant 0 : index
    %c0_2 = arith.constant 0 : index
    %1 = vector.load %arg2[%c0_1, %c0_2] : memref<56x64xbf16, #tpu.memory_space<vmem>>, vector<56x64xbf16>
    %2 = arith.truncf %0 : vector<64x2xf32> to vector<64x2xbf16>
    %cst = arith.constant dense<0.000000e+00> : vector<56x2xf32>
    %3 = tpu.matmul %1, %2, %cst {dimension_numbers = #tpu.dot_dimension_numbers<[1], [0], [0], [1], [0, 0, 1, 1], [], []>} : vector<56x64xbf16>, vector<64x2xbf16>, vector<56x2xf32> -> vector<56x2xf32>
    %c0_3 = arith.constant 0 : index
    %c0_4 = arith.constant 0 : index
    %4 = vector.load %arg3[%c0_3, %c0_4] : memref<56x1xf32, #tpu.memory_space<vmem>>, vector<56x1xf32>
    %5 = vector.broadcast %4 : vector<56x1xf32> to vector<56x2xf32>
    %6 = arith.addf %3, %5 : vector<56x2xf32>
    %cst_5 = arith.constant 0.000000e+00 : f32
    %7 = vector.broadcast %cst_5 : f32 to vector<56x2xf32>
    %8 = arith.maximumf %6, %7 : vector<56x2xf32>
    %c0_6 = arith.constant 0 : index
    %c0_7 = arith.constant 0 : index
    %9 = vector.load %arg4[%c0_6, %c0_7] : memref<48x56xbf16, #tpu.memory_space<vmem>>, vector<48x56xbf16>
    %10 = arith.truncf %8 : vector<56x2xf32> to vector<56x2xbf16>
    %cst_8 = arith.constant dense<0.000000e+00> : vector<48x2xf32>
    %11 = tpu.matmul %9, %10, %cst_8 {dimension_numbers = #tpu.dot_dimension_numbers<[1], [0], [0], [1], [0, 0, 1, 1], [], []>} : vector<48x56xbf16>, vector<56x2xbf16>, vector<48x2xf32> -> vector<48x2xf32>
    %c0_9 = arith.constant 0 : index
    %c0_10 = arith.constant 0 : index
    %12 = vector.load %arg5[%c0_9, %c0_10] : memref<48x1xf32, #tpu.memory_space<vmem>>, vector<48x1xf32>
    %13 = vector.broadcast %12 : vector<48x1xf32> to vector<48x2xf32>
    %14 = arith.addf %11, %13 : vector<48x2xf32>
    %c0_11 = arith.constant 0 : index
    %c0_12 = arith.constant 0 : index
    %15 = vector.load %arg10[%c0_11, %c0_12] : memref<48x2xf32, #tpu.memory_space<vmem>>, vector<48x2xf32>
    tpu.vector_store %arg10[%c0_11, %c0_12], %14 {strides = array<i32>} : memref<48x2xf32, #tpu.memory_space<vmem>>, vector<48x2xf32>,
    %c0_13 = arith.constant 0 : index
    %c0_14 = arith.constant 0 : index
    %16 = vector.load %arg6[%c0_13, %c0_14] : memref<56x48xbf16, #tpu.memory_space<vmem>>, vector<56x48xbf16>
    %17 = arith.truncf %14 : vector<48x2xf32> to vector<48x2xbf16>
    %cst_15 = arith.constant dense<0.000000e+00> : vector<56x2xf32>
    %18 = tpu.matmul %16, %17, %cst_15 {dimension_numbers = #tpu.dot_dimension_numbers<[1], [0], [0], [1], [0, 0, 1, 1], [], []>} : vector<56x48xbf16>, vector<48x2xbf16>, vector<56x2xf32> -> vector<56x2xf32>
    %c0_16 = arith.constant 0 : index
    %c0_17 = arith.constant 0 : index
    %19 = vector.load %arg7[%c0_16, %c0_17] : memref<56x1xf32, #tpu.memory_space<vmem>>, vector<56x1xf32>
    %20 = vector.broadcast %19 : vector<56x1xf32> to vector<56x2xf32>
    %21 = arith.addf %18, %20 : vector<56x2xf32>
    %cst_18 = arith.constant 0.000000e+00 : f32
    %22 = vector.broadcast %cst_18 : f32 to vector<56x2xf32>
    %23 = arith.maximumf %21, %22 : vector<56x2xf32>
    %c0_19 = arith.constant 0 : index
    %c0_20 = arith.constant 0 : index
    %24 = vector.load %arg8[%c0_19, %c0_20] : memref<64x56xbf16, #tpu.memory_space<vmem>>, vector<64x56xbf16>
    %25 = arith.truncf %23 : vector<56x2xf32> to vector<56x2xbf16>
    %cst_21 = arith.constant dense<0.000000e+00> : vector<64x2xf32>
    %26 = tpu.matmul %24, %25, %cst_21 {dimension_numbers = #tpu.dot_dimension_numbers<[1], [0], [0], [1], [0, 0, 1, 1], [], []>} : vector<64x56xbf16>, vector<56x2xbf16>, vector<64x2xf32> -> vector<64x2xf32>
    %c0_22 = arith.constant 0 : index
    %c0_23 = arith.constant 0 : index
    %27 = vector.load %arg9[%c0_22, %c0_23] : memref<64x1xf32, #tpu.memory_space<vmem>>, vector<64x1xf32>
    %28 = vector.broadcast %27 : vector<64x1xf32> to vector<64x2xf32>
    %29 = arith.addf %26, %28 : vector<64x2xf32>
    %c0_24 = arith.constant 0 : index
    %c0_25 = arith.constant 0 : index
    %30 = vector.load %arg11[%c0_24, %c0_25] : memref<64x2xf32, #tpu.memory_space<vmem>>, vector<64x2xf32>
    tpu.vector_store %arg11[%c0_24, %c0_25], %29 {strides = array<i32>} : memref<64x2xf32, #tpu.memory_space<vmem>>, vector<64x2xf32>,
    return
  }
  func.func @transform_0(%arg0: i32) -> (i32, i32) {
    %c0_i32 = arith.constant 0 : i32
    %c0_i32_0 = arith.constant 0 : i32
    return %c0_i32, %arg0 : i32, i32
  }
  func.func @transform_1(%arg0: i32) -> (i32, i32) {
    %c0_i32 = arith.constant 0 : i32
    %c0_i32_0 = arith.constant 0 : i32
    %c0_i32_1 = arith.constant 0 : i32
    return %c0_i32, %c0_i32_0 : i32, i32
  }
  func.func @transform_2(%arg0: i32) -> (i32, i32) {
    %c0_i32 = arith.constant 0 : i32
    %c0_i32_0 = arith.constant 0 : i32
    %c0_i32_1 = arith.constant 0 : i32
    return %c0_i32, %c0_i32_0 : i32, i32
  }
  func.func @transform_3(%arg0: i32) -> (i32, i32) {
    %c0_i32 = arith.constant 0 : i32
    %c0_i32_0 = arith.constant 0 : i32
    %c0_i32_1 = arith.constant 0 : i32
    return %c0_i32, %c0_i32_0 : i32, i32
  }
  func.func @transform_4(%arg0: i32) -> (i32, i32) {
    %c0_i32 = arith.constant 0 : i32
    %c0_i32_0 = arith.constant 0 : i32
    %c0_i32_1 = arith.constant 0 : i32
    return %c0_i32, %c0_i32_0 : i32, i32
  }
  func.func @transform_5(%arg0: i32) -> (i32, i32) {
    %c0_i32 = arith.constant 0 : i32
    %c0_i32_0 = arith.constant 0 : i32
    %c0_i32_1 = arith.constant 0 : i32
    return %c0_i32, %c0_i32_0 : i32, i32
  }
  func.func @transform_6(%arg0: i32) -> (i32, i32) {
    %c0_i32 = arith.constant 0 : i32
    %c0_i32_0 = arith.constant 0 : i32
    %c0_i32_1 = arith.constant 0 : i32
    return %c0_i32, %c0_i32_0 : i32, i32
  }
  func.func @transform_7(%arg0: i32) -> (i32, i32) {
    %c0_i32 = arith.constant 0 : i32
    %c0_i32_0 = arith.constant 0 : i32
    %c0_i32_1 = arith.constant 0 : i32
    return %c0_i32, %c0_i32_0 : i32, i32
  }
  func.func @transform_8(%arg0: i32) -> (i32, i32) {
    %c0_i32 = arith.constant 0 : i32
    %c0_i32_0 = arith.constant 0 : i32
    %c0_i32_1 = arith.constant 0 : i32
    return %c0_i32, %c0_i32_0 : i32, i32
  }
  func.func @transform_9(%arg0: i32) -> (i32, i32) {
    %c0_i32 = arith.constant 0 : i32
    %c0_i32_0 = arith.constant 0 : i32
    return %c0_i32, %arg0 : i32, i32
  }
  func.func @transform_10(%arg0: i32) -> (i32, i32) {
    %c0_i32 = arith.constant 0 : i32
    %c0_i32_0 = arith.constant 0 : i32
    return %c0_i32, %arg0 : i32, i32
  }
}

</mosaic_0001>

<bundles_post_ra>
// kernel: ae_1dcnn_forward.1
= control target key start
LH: loop header
LB: loop body
LE: loop exit
PB: predicated region body
PF: predicated region fallthrough
CT: control target
= control target key end

     0   :  { %v814_v3 = vmov 0   ;;  %vm114_vm0 = vcmask 523264   ;;  %v815_v45 = vmov 0.0   ;;  %vm816_vm1 = vmmov 0   ;;  %s1102_s0 = inlined_call_operand.vmem [shape: f32[64,2], index: 0, kind: input, shape index: {}]   ;;  %s1103_s1 = inlined_call_operand.vmem [shape: bf16[56,64], index: 1, kind: input, shape index: {}]   ;;  %s1104_s2 = inlined_call_operand.vmem [shape: f32[56,1], index: 2, kind: input, shape index: {}]   ;;  %s1105_s4 = inlined_call_operand.vmem [shape: f32[48,1], index: 4, kind: input, shape index: {}]   ;;  %s1106_s6 = inlined_call_operand.vmem [shape: f32[56,1], index: 6, kind: input, shape index: {}]   ;;  %s1107_s8 = inlined_call_operand.vmem [shape: f32[64,1], index: 8, kind: input, shape index: {}]   ;;  %s1108_s3 = inlined_call_operand.vmem [shape: bf16[48,56], index: 3, kind: input, shape index: {}]   ;;  %s1109_s5 = inlined_call_operand.vmem [shape: bf16[56,48], index: 5, kind: input, shape index: {}]   ;;  %s1110_s9 = inlined_call_operand.vmem [shape: f32[48,2], index: 9, kind: output, shape index: {0}]   ;;  %s1111_s7 = inlined_call_operand.vmem [shape: bf16[64,56], index: 7, kind: input, shape index: {}]   ;;  %s1112_s10 = inlined_call_operand.vmem [shape: f32[64,2], index: 10, kind: output, shape index: {1}]  }
   0x1   :  { %v41_v0 = vld [vmem:[%s1102_s0 + $0x30] sm:$0xff]  ;;  %v42_v1 = vld [vmem:[%s1102_s0 + $0x38] sm:$0xff]  ;;  %v39_v2 = vld [vmem:[%s1102_s0 + $0x20] sm:$0xff]  ;;  %797 = vset.pattern.permute.xlu0 %v814_v3  ;;  %798 = vset.pattern.permute.xlu1 %v814_v3  ;;  %vm269_vm2 = vcmask 1043456   ;;  %vm259_vm3 = vcmask 457728   ;;  %vm407_vm4 = vcmask 392192  }
   0x2   :  { %v53_v4 = vpack.c.bf16 %v42_v1, %v41_v0  ;;  %v40_v5 = vld [vmem:[%s1102_s0 + $0x28] sm:$0xff]  ;;  %v37_v7 = vld [vmem:[%s1102_s0 + $0x10] sm:$0xff]  ;;  %v38_v8 = vld [vmem:[%s1102_s0 + $0x18] sm:$0xff]  ;;  %743 = vmatprep.subr.bf16.mxu1 %v815_v45  ;;  %751 = vmatprep.mubr.msk.bf16.mxu1 %vm816_vm1, %v815_v45  ;;  %vm330_vm5 = vcmask 15360  }
   0x3   :  { %v52_v6 = vpack.c.bf16 %v40_v5, %v39_v2  ;;  %v799_v9 = vld [vmem:[%s1103_s1] sm:$0xff]   ;;  %v51_v10 = vpack.c.bf16 %v38_v8, %v37_v7  ;;  %v36_v12 = vld [vmem:[%s1102_s0 + $0x8] sm:$0xff]  ;;  %v60_v13 = vld [vmem:[%s1104_s2 + $0x30] sm:$0xff] }
   0x4   :  { %727 = vmatprep.subr.bf16.mxu0 %v53_v4  ;;  %735 = vmatprep.mubr.msk.bf16.mxu0 %vm114_vm0, %v799_v9  ;;  %v35_v11 = vld [vmem:[%s1102_s0] sm:$0xff]  ;;  %v59_v14 = vld [vmem:[%s1104_s2 + $0x28] sm:$0xff]  ;;  %v56_v17 = vld [vmem:[%s1104_s2 + $0x10] sm:$0xff] }
   0x5   :  { %728 = vmatpush3.bf16.msra.mxu0 %v53_v4  ;;  %93 = vperm.xlu0 %797, %v60_v13   ;;  %v58_v15 = vld [vmem:[%s1104_s2 + $0x20] sm:$0xff]  ;;  %v50_v16 = vpack.c.bf16 %v36_v12, %v35_v11  ;;  %v57_v18 = vld [vmem:[%s1104_s2 + $0x18] sm:$0xff]  ;;  %v800_v20 = vld [vmem:[%s1103_s1 + $0x8] sm:$0xff]  }
   0x6   :  { %729 = vmatprep.subr.bf16.mxu0 %v52_v6  ;;  %88 = vperm.xlu1 %798, %v59_v14   ;;  %v54_v19 = vld [vmem:[%s1104_s2] sm:$0xff]  ;;  %v801_v21 = vld [vmem:[%s1103_s1 + $0x10] sm:$0xff]   ;;  %v55_v22 = vld [vmem:[%s1104_s2 + $0x8] sm:$0xff] }
   0x7   :  { %v212_v23 = vld [vmem:[%s1105_s4 + $0x20] sm:$0xff]  ;;  %v213_v24 = vld [vmem:[%s1105_s4 + $0x28] sm:$0xff]  ;;  %v210_v25 = vld [vmem:[%s1105_s4 + $0x10] sm:$0xff] }
   0x8   :  { %v802_v26 = vld [vmem:[%s1103_s1 + $0x18] ss:$0 sps:$4 sm:$0xff]   ;;  %v208_v28 = vld [vmem:[%s1105_s4] sm:$0xff]  ;;  %v209_v29 = vld [vmem:[%s1105_s4 + $0x8] sm:$0xff] }
   0x9   :  { %730 = vmatpush3.bf16.msra.mxu0 %v52_v6  ;;  %83 = vperm.xlu0 %797, %v58_v15   ;;  %v211_v27 = vld [vmem:[%s1105_s4 + $0x18] sm:$0xff]  ;;  %v353_v30 = vld [vmem:[%s1106_s6 + $0x30] sm:$0xff]  ;;  %v351_v31 = vld [vmem:[%s1106_s6 + $0x20] sm:$0xff] }
   0xa   :  { %731 = vmatprep.subr.bf16.mxu0 %v51_v10  ;;  %73 = vperm.xlu1 %798, %v56_v17   ;;  %v352_v32 = vld [vmem:[%s1106_s6 + $0x28] sm:$0xff]  ;;  %v349_v33 = vld [vmem:[%s1106_s6 + $0x10] sm:$0xff]  ;;  %v350_v34 = vld [vmem:[%s1106_s6 + $0x18] sm:$0xff] }
   0xb   :  { %v347_v35 = vld [vmem:[%s1106_s6] sm:$0xff]  ;;  %v348_v36 = vld [vmem:[%s1106_s6 + $0x8] sm:$0xff]  ;;  %v505_v39 = vld [vmem:[%s1107_s8 + $0x10] sm:$0xff] }
   0xc   :  { %v503_v37 = vld [vmem:[%s1107_s8] sm:$0xff]  ;;  %v504_v38 = vld [vmem:[%s1107_s8 + $0x8] sm:$0xff]  ;;  %v506_v40 = vld [vmem:[%s1107_s8 + $0x18] sm:$0xff] }
   0xd   :  { %732 = vmatpush3.bf16.msra.mxu0 %v51_v10  ;;  %78 = vperm.xlu0 %797, %v57_v18   ;;  %v507_v41 = vld [vmem:[%s1107_s8 + $0x20] sm:$0xff]  ;;  %v508_v42 = vld [vmem:[%s1107_s8 + $0x28] sm:$0xff]  ;;  %v509_v43 = vld [vmem:[%s1107_s8 + $0x30] sm:$0xff] }
   0xe   :  { %733 = vmatprep.subr.bf16.mxu0 %v50_v16  ;;  %63 = vperm.xlu1 %798, %v54_v19   ;;  %v510_v44 = vld [vmem:[%s1107_s8 + $0x38] sm:$0xff]  ;;  %v804_v17 = vld [vmem:[%s1108_s3 + $0x8] sm:$0xff]   ;;  %v805_v18 = vld [vmem:[%s1108_s3 + $0x10] sm:$0xff]  }
   0xf   :  { %v806_v19 = vld [vmem:[%s1109_s5] sm:$0xff]  }
  0x11   :  { %734 = vmatpush3.bf16.msra.mxu0 %v50_v16  ;;  %68 = vperm.xlu0 %797, %v55_v22   ;;  %v803_v16 = vld [vmem:[%s1108_s3] sm:$0xff]  }
  0x12   :  { %236 = vperm.xlu1 %798, %v212_v23  }
  0x14   :  { %736 = vmatmul.mubr.msk.bf16.vlgmr.msra.gmra.mxu0 %vm114_vm0, %v800_v20 }
  0x15   :  { %739 = vmatprep.mubr.msk.bf16.mxu0 %vm114_vm0, %v801_v21  ;;  %241 = vperm.xlu0 %797, %v213_v24  }
  0x16   :  { %226 = vperm.xlu1 %798, %v210_v25  }
  0x19   :  { %231 = vperm.xlu0 %797, %v211_v27  }
  0x1a   :  { %216 = vperm.xlu1 %798, %v208_v28  }
  0x1c   :  { %740 = vmatmul.mubr.msk.bf16.gmra.mxu0 %vm114_vm0, %v802_v26 }
  0x1d   :  { %221 = vperm.xlu0 %797, %v209_v29   ;;  %769 = vmatprep.mubr.msk.bf16.mxu0 %vm407_vm4, %v806_v19 }
  0x1e   :  { %386 = vperm.xlu1 %798, %v353_v30  }
  0x21   :  { %376 = vperm.xlu0 %797, %v351_v31  }
  0x22   :  { %381 = vperm.xlu1 %798, %v352_v32  }
  0x25   :  { %366 = vperm.xlu0 %797, %v349_v33  }
  0x26   :  { %371 = vperm.xlu1 %798, %v350_v34  }
  0x29   :  { %356 = vperm.xlu0 %797, %v347_v35  }
  0x2a   :  { %361 = vperm.xlu1 %798, %v348_v36  }
  0x2d   :  { %513 = vperm.xlu0 %797, %v503_v37  }
  0x2e   :  { %518 = vperm.xlu1 %798, %v504_v38  }
  0x31   :  { %523 = vperm.xlu0 %797, %v505_v39  }
  0x32   :  { %528 = vperm.xlu1 %798, %v506_v40  }
  0x35   :  { %533 = vperm.xlu0 %797, %v507_v41  }
  0x36   :  { %538 = vperm.xlu1 %798, %v508_v42  }
  0x39   :  { %543 = vperm.xlu0 %797, %v509_v43  }
  0x3a   :  { %548 = vperm.xlu1 %798, %v510_v44  }
  0x80   :  { %v94_v46 = vpop.permute.xlu0 %93 }
  0x81   :  { %v89_v52 = vpop.permute.xlu1 %88 }
  0x84   :  { %v84_v50 = vpop.permute.xlu0 %83 }
  0x85   :  { %v74_v61 = vpop.permute.xlu1 %73 }
  0x88   :  { %v79_v57 = vpop.permute.xlu0 %78 }
  0x89   :  { %v64_v9 = vpop.permute.xlu1 %63 }
  0x8c   :  { %v69_v5 = vpop.permute.xlu0 %68 }
  0x8d   :  { %v237_v20 = vpop.permute.xlu1 %236 }
  0x90   :  { %v242_v21 = vpop.permute.xlu0 %241 }
  0x91   :  { %v227_v22 = vpop.permute.xlu1 %226 }
  0x94   :  { %v232_v23 = vpop.permute.xlu0 %231 }
  0x95   :  { %v217_v24 = vpop.permute.xlu1 %216 }
  0x98   :  { %v222_v28 = vpop.permute.xlu0 %221 }
  0xd4   :  { %v737_v47 = vpop.f32.mrf.mxu0 }
  0xd5   :  { %v170_v2 = vadd.f32 %v737_v47, %v74_v61  ;;  %v807_v47 = vld [vmem:[%s1109_s5 + $0x8] sm:$0xff]  }
  0xd6   :  { %v161_v48 = vpop.f32.mrf.mxu0 }
  0xd7   :  { %v193_v10 = vmax.f32 %v170_v2, 0.0  ;;  %v162_v11 = vadd.f32 %v161_v48, %v64_v9  ;;  %v808_v48 = vld [vmem:[%s1109_s5 + $0x10] sm:$0xff]  }
  0xd8   :  { %v738_v49 = vpop.f32.mrf.mxu0 }
  0xd9   :  { %v173_v63 = vadd.f32 %v738_v49, %v79_v57  ;;  %v191_v14 = vmax.f32 %v162_v11, 0.0  ;;  %v809_v49 = vld [vmem:[%s1109_s5 + $0x18] ss:$0 sps:$4 sm:$0xff]  }
  0xda   :  { %v164_v51 = vpop.f32.mrf.mxu0 }
  0xdb   :  { %v194_v6 = vmax.f32 %v173_v63, 0.0  ;;  %v165_v7 = vadd.f32 %v164_v51, %v69_v5  ;;  %v387_v51 = vpop.permute.xlu1 %386 }
  0xdc   :  { %v741_v53 = vpop.f32.mrf.mxu0 }
  0xdd   :  { %v186_v54 = vadd.f32 %v741_v53, %v94_v46  ;;  %v205_v12 = vpack.c.bf16 %v194_v6, %v193_v10  ;;  %v192_v13 = vmax.f32 %v165_v7, 0.0 }
  0xde   :  { %v177_v55 = vpop.f32.mrf.mxu0 }
  0xdf   :  { %v197_v56 = vmax.f32 %v186_v54, 0.0  ;;  %v178_v60 = vadd.f32 %v177_v55, %v84_v50  ;;  %v204_v15 = vpack.c.bf16 %v192_v13, %v191_v14  ;;  %v810_v50 = vld [vmem:[%s1111_s7] sm:$0xff]   ;;  %v382_v54 = vpop.permute.xlu1 %381 }
  0xe0   :  { %v742_v58 = vpop.f32.mrf.mxu0 }
  0xe1   :  { %v207_v59 = vpack.c.bf16 %v197_v56, %v197_v56  ;;  %v195_v3 = vmax.f32 %v178_v60, 0.0  ;;  %v377_v56 = vpop.permute.xlu0 %376 }
  0xe2   :  { %v180_v62 = vpop.f32.mrf.mxu0 }
  0xe3   :  { %v181_v0 = vadd.f32 %v180_v62, %v89_v52  ;;  %v271_v1 = vsel %vm269_vm2, %v207_v59, 0  ;;  %v372_v60 = vpop.permute.xlu1 %371 }
  0xe4   :  { %744 = vmatpush3.bf16.msra.mxu1 %v271_v1 }
  0xe5   :  { %v196_v4 = vmax.f32 %v181_v0, 0.0  ;;  %745 = vmatprep.subr.bf16.mxu1 %v815_v45  ;;  %v367_v63 = vpop.permute.xlu0 %366 }
  0xe7   :  { %v206_v8 = vpack.c.bf16 %v196_v4, %v195_v3 }
  0xe9   :  { %746 = vmatpush3.bf16.msra.mxu1 %v206_v8  ;;  %v362_v8 = vpop.permute.xlu1 %361  ;;  %v357_v13 = vpop.permute.xlu0 %356 }
  0xea   :  { %747 = vmatprep.subr.bf16.mxu1 %v815_v45 }
  0xed   :  { %748 = vmatpush3.bf16.msra.mxu1 %v205_v12 }
  0xee   :  { %749 = vmatprep.subr.bf16.mxu1 %v815_v45 }
  0xf1   :  { %750 = vmatpush3.bf16.msra.mxu1 %v204_v15 }
  0xf4   :  { %752 = vmatmul.mubr.msk.bf16.vlgmr.msra.gmra.mxu1 %vm259_vm3, %v803_v16 }
  0xf5   :  { %755 = vmatprep.mubr.msk.bf16.mxu1 %vm816_vm1, %v815_v45 }
  0xfc   :  { %756 = vmatmul.mubr.msk.bf16.gmra.mxu1 %vm259_vm3, %v804_v17 }
  0xfd   :  { %759 = vmatprep.mubr.msk.bf16.mxu1 %vm816_vm1, %v815_v45 }
 0x104   :  { %760 = vmatmul.mubr.msk.bf16.gmra.mxu1 %vm259_vm3, %v805_v18 }
 0x105   :  { %785 = vmatprep.mubr.msk.bf16.mxu1 %vm259_vm3, %v810_v50 }
 0x1b4   :  { %v307_v25 = vpop.f32.mrf.mxu1 }
 0x1b5   :  { %v308_v26 = vadd.f32 %v307_v25, %v217_v24  ;;  %v514_v24 = vpop.permute.xlu0 %513  ;;  %v519_v25 = vpop.permute.xlu1 %518 }
 0x1b6   :  { %v753_v27 = vpop.f32.mrf.mxu1 }
 0x1b7   :  { %331 = vst.msk [vmem:[%s1110_s9] sm:$0xff] %vm330_vm5, %v308_v26 }
 0x1b8   :  { %v310_v29 = vpop.f32.mrf.mxu1 }
 0x1b9   :  { %v311_v30 = vadd.f32 %v310_v29, %v222_v28  ;;  %v529_v27 = vpop.permute.xlu1 %528 }
 0x1ba   :  { %v754_v31 = vpop.f32.mrf.mxu1 }
 0x1bb   :  { %332 = vst.msk [vmem:[%s1110_s9 + $0x8] sm:$0xff] %vm330_vm5, %v311_v30  ;;  %v344_v46 = vpack.c.bf16 %v311_v30, %v308_v26  ;;  %v524_v26 = vpop.permute.xlu0 %523 }
 0x1bc   :  { %v315_v32 = vpop.f32.mrf.mxu1 }
 0x1bd   :  { %v316_v33 = vadd.f32 %v315_v32, %v227_v22  ;;  %v812_v22 = vld [vmem:[%s1111_s7 + $0x10] sm:$0xff]  }
 0x1be   :  { %v757_v34 = vpop.f32.mrf.mxu1 }
 0x1bf   :  { %333 = vst.msk [vmem:[%s1110_s9 + $0x10] sm:$0xff] %vm330_vm5, %v316_v33  ;;  %v534_v30 = vpop.permute.xlu0 %533 }
 0x1c0   :  { %v318_v35 = vpop.f32.mrf.mxu1 }
 0x1c1   :  { %v319_v36 = vadd.f32 %v318_v35, %v232_v23  ;;  %v813_v23 = vld [vmem:[%s1111_s7 + $0x18] sm:$0xff]   ;;  %v539_v35 = vpop.permute.xlu1 %538 }
 0x1c2   :  { %v758_v37 = vpop.f32.mrf.mxu1 }
 0x1c3   :  { %334 = vst.msk [vmem:[%s1110_s9 + $0x18] sm:$0xff] %vm330_vm5, %v319_v36  ;;  %v345_v45 = vpack.c.bf16 %v319_v36, %v316_v33 }
 0x1c4   :  { %v323_v38 = vpop.f32.mrf.mxu1 }
 0x1c5   :  { %v324_v39 = vadd.f32 %v323_v38, %v237_v20  ;;  %v544_v38 = vpop.permute.xlu0 %543 }
 0x1c6   :  { %v761_v40 = vpop.f32.mrf.mxu1 }
 0x1c7   :  { %335 = vst.msk [vmem:[%s1110_s9 + $0x20] sm:$0xff] %vm330_vm5, %v324_v39 }
 0x1c8   :  { %v326_v41 = vpop.f32.mrf.mxu1 }
 0x1c9   :  { %v327_v42 = vadd.f32 %v326_v41, %v242_v21  ;;  %v811_v21 = vld [vmem:[%s1111_s7 + $0x8] sm:$0xff]  }
 0x1ca   :  { %v762_v43 = vpop.f32.mrf.mxu1 }
 0x1cb   :  { %336 = vst.msk [vmem:[%s1110_s9 + $0x28] sm:$0xff] %vm330_vm5, %v327_v42  ;;  %v346_v44 = vpack.c.bf16 %v327_v42, %v324_v39  ;;  %v549_v43 = vpop.permute.xlu1 %548 }
 0x1cd   :  { %763 = vmatprep.subr.bf16.mxu0 %v346_v44 }
 0x1ce   :  { %764 = vmatpush3.bf16.msra.mxu0 %v346_v44 }
 0x1cf   :  { %765 = vmatprep.subr.bf16.mxu0 %v345_v45 }
 0x1d2   :  { %766 = vmatpush3.bf16.msra.mxu0 %v345_v45 }
 0x1d3   :  { %767 = vmatprep.subr.bf16.mxu0 %v344_v46 }
 0x1d6   :  { %768 = vmatpush3.bf16.msra.mxu0 %v344_v46 }
 0x1d9   :  { %770 = vmatmul.mubr.msk.bf16.vlgmr.msra.gmra.mxu0 %vm407_vm4, %v807_v47 }
 0x1da   :  { %773 = vmatprep.mubr.msk.bf16.mxu0 %vm407_vm4, %v808_v48 }
 0x1e1   :  { %774 = vmatmul.mubr.msk.bf16.gmra.mxu0 %vm407_vm4, %v809_v49 }
 0x299   :  { %v771_v52 = vpop.f32.mrf.mxu0 }
 0x29a   :  { %v463_v5 = vadd.f32 %v771_v52, %v367_v63 }
 0x29b   :  { %v454_v53 = vpop.f32.mrf.mxu0 }
 0x29c   :  { %v486_v14 = vmax.f32 %v463_v5, 0.0  ;;  %v455_v15 = vadd.f32 %v454_v53, %v357_v13 }
 0x29d   :  { %v772_v55 = vpop.f32.mrf.mxu0 }
 0x29e   :  { %v466_v1 = vadd.f32 %v772_v55, %v372_v60  ;;  %v484_v19 = vmax.f32 %v455_v15, 0.0 }
 0x29f   :  { %v457_v57 = vpop.f32.mrf.mxu0 }
 0x2a0   :  { %v487_v9 = vmax.f32 %v466_v1, 0.0  ;;  %v458_v10 = vadd.f32 %v457_v57, %v362_v8 }
 0x2a1   :  { %v775_v58 = vpop.f32.mrf.mxu0 }
 0x2a2   :  { %v479_v59 = vadd.f32 %v775_v58, %v387_v51  ;;  %v500_v17 = vpack.c.bf16 %v487_v9, %v486_v14  ;;  %v485_v18 = vmax.f32 %v458_v10, 0.0 }
 0x2a3   :  { %v470_v61 = vpop.f32.mrf.mxu0 }
 0x2a4   :  { %v490_v62 = vmax.f32 %v479_v59, 0.0  ;;  %v471_v3 = vadd.f32 %v470_v61, %v377_v56  ;;  %v499_v20 = vpack.c.bf16 %v485_v18, %v484_v19 }
 0x2a5   :  { %v776_v0 = vpop.f32.mrf.mxu0 }
 0x2a6   :  { %v502_v2 = vpack.c.bf16 %v490_v62, %v490_v62  ;;  %v488_v11 = vmax.f32 %v471_v3, 0.0 }
 0x2a7   :  { %v473_v4 = vpop.f32.mrf.mxu0 }
 0x2a8   :  { %v474_v6 = vadd.f32 %v473_v4, %v382_v54  ;;  %793 = vmatprep.subr.msk.bf16.mxu1 %vm269_vm2, %v502_v2  ;;  %v584_v7 = vsel %vm269_vm2, %v502_v2, 0 }
 0x2a9   :  { %778 = vmatpush3.bf16.msra.mxu1 %v584_v7 }
 0x2aa   :  { %v489_v12 = vmax.f32 %v474_v6, 0.0 }
 0x2ac   :  { %v501_v16 = vpack.c.bf16 %v489_v12, %v488_v11 }
 0x2ae   :  { %779 = vmatprep.subr.bf16.mxu1 %v501_v16 }
 0x2af   :  { %780 = vmatpush3.bf16.msra.mxu1 %v501_v16 }
 0x2b0   :  { %781 = vmatprep.subr.bf16.mxu1 %v500_v17 }
 0x2b3   :  { %782 = vmatpush3.bf16.msra.mxu1 %v500_v17 }
 0x2b4   :  { %783 = vmatprep.subr.bf16.mxu1 %v499_v20 }
 0x2b7   :  { %784 = vmatpush3.bf16.msra.mxu1 %v499_v20 }
 0x2ba   :  { %786 = vmatmul.mubr.msk.bf16.vlgmr.msra.gmra.mxu1 %vm259_vm3, %v811_v21 }
 0x2bb   :  { %789 = vmatprep.mubr.msk.bf16.mxu1 %vm259_vm3, %v812_v22 }
 0x2c2   :  { %790 = vmatmul.mubr.msk.bf16.gmra.mxu1 %vm259_vm3, %v813_v23 }
 0x37a   :  { %v787_v28 = vpop.f32.mrf.mxu1 }
 0x37b   :  { %v629_v29 = vadd.f32 %v787_v28, %v524_v26 }
 0x37c   :  { %v620_v31 = vpop.f32.mrf.mxu1 }
 0x37d   :  { %653 = vst.msk [vmem:[%s1112_s10 + $0x10] sm:$0xff] %vm330_vm5, %v629_v29  ;;  %v621_v32 = vadd.f32 %v620_v31, %v514_v24 }
 0x37e   :  { %v788_v33 = vpop.f32.mrf.mxu1 }
 0x37f   :  { %651 = vst.msk [vmem:[%s1112_s10] sm:$0xff] %vm330_vm5, %v621_v32  ;;  %v632_v34 = vadd.f32 %v788_v33, %v529_v27 }
 0x380   :  { %v623_v36 = vpop.f32.mrf.mxu1 }
 0x381   :  { %654 = vst.msk [vmem:[%s1112_s10 + $0x18] sm:$0xff] %vm330_vm5, %v632_v34  ;;  %v624_v37 = vadd.f32 %v623_v36, %v519_v25 }
 0x382   :  { %v791_v39 = vpop.f32.mrf.mxu1 }
 0x383   :  { %652 = vst.msk [vmem:[%s1112_s10 + $0x8] sm:$0xff] %vm330_vm5, %v624_v37  ;;  %v645_v40 = vadd.f32 %v791_v39, %v544_v38 }
 0x384   :  { %v636_v41 = vpop.f32.mrf.mxu1 }
 0x385   :  { %657 = vst.msk [vmem:[%s1112_s10 + $0x30] sm:$0xff] %vm330_vm5, %v645_v40  ;;  %v637_v42 = vadd.f32 %v636_v41, %v534_v30 }
 0x386   :  { %v792_v44 = vpop.f32.mrf.mxu1 }
 0x387   :  { %655 = vst.msk [vmem:[%s1112_s10 + $0x20] sm:$0xff] %vm330_vm5, %v637_v42  ;;  %v648_v45 = vadd.f32 %v792_v44, %v549_v43 }
 0x388   :  { %v639_v46 = vpop.f32.mrf.mxu1 }
 0x389   :  { %658 = vst.msk [vmem:[%s1112_s10 + $0x38] sm:$0xff] %vm330_vm5, %v648_v45  ;;  %v640_v47 = vadd.f32 %v639_v46, %v539_v35 }
 0x38b   :  { %656 = vst.msk [vmem:[%s1112_s10 + $0x28] sm:$0xff] %vm330_vm5, %v640_v47 }

</bundles_post_ra>
